<compile_context>
chip_gen: v7x
topology: tpu7x:2x2x1
jax: 0.10.0
libtpu: 0.0.40
codegen_flags: <defaults>
</compile_context>

<pallas_src>
import jax
import jax.numpy as jnp
from jax.experimental import pallas as pl
from jax.experimental.pallas import tpu as pltpu

# ---------------------------------------------------------------------------
# Model hyper-parameters (synthetic, small)
# ---------------------------------------------------------------------------
B = 2                       # batch
C = 4                       # input channels
HW = 16                     # spatial size (H = W)
P = 8                       # patch size
PATCH_DIM = C * P * P       # 256 flattened patch features
EMBED_DIM = 128             # backbone feature dim D
MLP_HID = 256               # mlp hidden dim
NUM_CLASSES = 16            # classifier output dim
PADDED_CLASSES = 128        # lane-dense logits store (slice back in wrapper)


# ---------------------------------------------------------------------------
# Fused Pallas kernel: patch-embed projection (backbone) + MLP head
# ---------------------------------------------------------------------------
def _dino_fused_kernel(pooled_ref, we_ref, be_ref, w1_ref, b1_ref,
                       w2_ref, b2_ref, feat_ref, out_ref):
    """pooled_ref: [TM, PATCH_DIM]              bf16 (mean-pooled patches)
       we_ref:     [PATCH_DIM, EMBED_DIM]       bf16
       be_ref:     [1, EMBED_DIM]               f32
       w1_ref:     [EMBED_DIM, MLP_HID]         bf16,  b1_ref: [1, MLP_HID]        f32
       w2_ref:     [MLP_HID, PADDED_CLASSES]    bf16,  b2_ref: [1, PADDED_CLASSES] f32
       feat_ref:   [TM, EMBED_DIM]              f32
       out_ref:    [TM, PADDED_CLASSES]         f32
    """
    # ---- backbone: patch-embed projection (pooling already done wrapper-side) ----
    feat = jnp.dot(pooled_ref[...], we_ref[...],
                   preferred_element_type=jnp.float32) + be_ref[...]
    feat_ref[...] = feat                                    # f32 features out

    # ---- mlp head: Linear -> GELU (f32) -> Linear ----
    h = jnp.dot(feat.astype(jnp.bfloat16), w1_ref[...],
                preferred_element_type=jnp.float32) + b1_ref[...]
    # TODO(synk): PyTorch nn.GELU defaults to the exact erf form; the tanh
    # approximation is used here because it lowers to the (free) EUP slot on
    # every TPU generation.
    h = jax.nn.gelu(h, approximate=True)
    logits = jnp.dot(h.astype(jnp.bfloat16), w2_ref[...],
                     preferred_element_type=jnp.float32) + b2_ref[...]
    out_ref[...] = logits                                   # lane-dense (128) store


def dino_fused_pallas(pooled_bf16, params):
    b = pooled_bf16.shape[0]
    # Batch row tile: multiple of 8 sublanes, capped at 128 rows per grid step.
    tm = min(128, ((b + 7) // 8) * 8)
    padded_b = pl.cdiv(b, tm) * tm
    if padded_b != b:
        pooled_bf16 = jnp.pad(pooled_bf16, ((0, padded_b - b), (0, 0)))
    grid = (padded_b // tm,)

    flops = 2 * padded_b * (PATCH_DIM * EMBED_DIM
                            + EMBED_DIM * MLP_HID
                            + MLP_HID * PADDED_CLASSES)
    weight_bytes = 2 * (PATCH_DIM * EMBED_DIM + EMBED_DIM * MLP_HID
                        + MLP_HID * PADDED_CLASSES)
    bias_bytes = 4 * (EMBED_DIM + MLP_HID + PADDED_CLASSES)
    io_bytes = (padded_b * PATCH_DIM * 2
                + padded_b * (EMBED_DIM + PADDED_CLASSES) * 4)
    cost = pl.CostEstimate(flops=flops,
                           transcendentals=padded_b * MLP_HID,
                           bytes_accessed=weight_bytes + bias_bytes + io_bytes)

    row_map = lambda i: (i, 0)      # batch-tiled arrays
    const_map = lambda i: (0, 0)    # weights/biases: VMEM-resident across tiles

    feat, logits = pl.pallas_call(
        _dino_fused_kernel,
        out_shape=(jax.ShapeDtypeStruct((padded_b, EMBED_DIM), jnp.float32),
                   jax.ShapeDtypeStruct((padded_b, PADDED_CLASSES), jnp.float32)),
        grid_spec=pltpu.PrefetchScalarGridSpec(
            num_scalar_prefetch=0,
            grid=grid,
            in_specs=[
                pl.BlockSpec((tm, PATCH_DIM), row_map),
                pl.BlockSpec((PATCH_DIM, EMBED_DIM), const_map),
                pl.BlockSpec((1, EMBED_DIM), const_map),
                pl.BlockSpec((EMBED_DIM, MLP_HID), const_map),
                pl.BlockSpec((1, MLP_HID), const_map),
                pl.BlockSpec((MLP_HID, PADDED_CLASSES), const_map),
                pl.BlockSpec((1, PADDED_CLASSES), const_map),
            ],
            out_specs=(pl.BlockSpec((tm, EMBED_DIM), row_map),
                       pl.BlockSpec((tm, PADDED_CLASSES), row_map)),
        ),
        compiler_params=pltpu.CompilerParams(
            dimension_semantics=("parallel",)),   # both TCs on v7x at scale
        cost_estimate=cost,
    )(pooled_bf16, params["w_embed"], params["b_embed"],
      params["w1"], params["b1"], params["w2"], params["b2"])
    return feat, logits


# ---------------------------------------------------------------------------
# Glue: fused patchify + mean-pool (single reduction, no 6-D transpose)
# ---------------------------------------------------------------------------
def pool_patches_nchw(x):
    """[B, C, H, W] -> [B, C*P*P]: mean over non-overlapping P x P patch grid.

    Element (c, pi, pj) of the result equals the mean over all patches of that
    flattened patch feature, identical to patchify-then-mean(axis=1)."""
    b, c, h, w = x.shape
    gh, gw = h // P, w // P
    pooled = x.reshape(b, c, gh, P, gw, P).mean(axis=(2, 4))   # [B, C, P, P]
    return pooled.reshape(b, c * P * P)


def dino_classifier_forward(x_nchw, params):
    """Reproduces DINOClassifier.forward: returns (features, mlp(features))."""
    b = x_nchw.shape[0]
    pooled = pool_patches_nchw(x_nchw.astype(jnp.float32)).astype(jnp.bfloat16)
    feat, logits_padded = dino_fused_pallas(pooled, params)
    return feat[:b], logits_padded[:b, :NUM_CLASSES]


# ---------------------------------------------------------------------------
# Deterministic parameter init (weights bf16, biases f32; w2/b2 lane-padded)
# ---------------------------------------------------------------------------
def init_params(key):
    ks = jax.random.split(key, 6)
    scale_e = 1.0 / jnp.sqrt(PATCH_DIM)
    scale_1 = 1.0 / jnp.sqrt(EMBED_DIM)
    scale_2 = 1.0 / jnp.sqrt(MLP_HID)

    w2 = jax.random.normal(ks[4], (MLP_HID, NUM_CLASSES), jnp.float32) * scale_2
    b2 = jax.random.normal(ks[5], (1, NUM_CLASSES), jnp.float32) * 0.01
    # Zero-pad classifier to 128 output lanes for lane-dense MXU/store.
    w2p = jnp.zeros((MLP_HID, PADDED_CLASSES), jnp.float32).at[:, :NUM_CLASSES].set(w2)
    b2p = jnp.zeros((1, PADDED_CLASSES), jnp.float32).at[:, :NUM_CLASSES].set(b2)

    return {
        "w_embed": (jax.random.normal(ks[0], (PATCH_DIM, EMBED_DIM),
                                      jnp.float32) * scale_e).astype(jnp.bfloat16),
        "b_embed": jax.random.normal(ks[1], (1, EMBED_DIM), jnp.float32) * 0.01,
        "w1": (jax.random.normal(ks[2], (EMBED_DIM, MLP_HID),
                                 jnp.float32) * scale_1).astype(jnp.bfloat16),
        "b1": jax.random.normal(ks[3], (1, MLP_HID), jnp.float32) * 0.01,
        "w2": w2p.astype(jnp.bfloat16),
        "b2": b2p,
    }


def reference_forward(x_nchw, params):
    """Pure-JAX reference mirroring the kernel's mixed-precision math."""
    pooled = pool_patches_nchw(x_nchw.astype(jnp.float32)).astype(jnp.bfloat16)
    feat = jnp.dot(pooled, params["w_embed"],
                   preferred_element_type=jnp.float32) + params["b_embed"]
    h = jnp.dot(feat.astype(jnp.bfloat16), params["w1"],
                preferred_element_type=jnp.float32) + params["b1"]
    h = jax.nn.gelu(h, approximate=True)
    logits = jnp.dot(h.astype(jnp.bfloat16), params["w2"],
                     preferred_element_type=jnp.float32) + params["b2"]
    return feat, logits[:, :NUM_CLASSES]


# ---------------------------------------------------------------------------
if __name__ == "__main__":
    key = jax.random.PRNGKey(0)
    k_x, k_p = jax.random.split(key)
    x = jax.random.normal(k_x, (B, C, HW, HW), jnp.float32)   # NCHW input
    params = init_params(k_p)

    feat, logits = jax.block_until_ready(
        jax.jit(dino_classifier_forward)(x, params))

    feat_ref, logits_ref = reference_forward(x, params)
    assert feat.shape == (B, EMBED_DIM) and logits.shape == (B, NUM_CLASSES)
    assert jnp.allclose(feat, feat_ref, atol=2e-3, rtol=2e-3)
    assert jnp.allclose(logits, logits_ref, atol=2e-3, rtol=2e-3)

    print("KERNEL_OK")
</pallas_src>

<mosaic_0001>
module attributes {stable_mosaic.version = 11 : i64} {
  func.func @_dino_fused_kernel(%arg0: i32, %arg1: memref<8x256xbf16, #tpu.memory_space<vmem>>, %arg2: memref<256x128xbf16, #tpu.memory_space<vmem>>, %arg3: memref<1x128xf32, #tpu.memory_space<vmem>>, %arg4: memref<128x256xbf16, #tpu.memory_space<vmem>>, %arg5: memref<1x256xf32, #tpu.memory_space<vmem>>, %arg6: memref<256x128xbf16, #tpu.memory_space<vmem>>, %arg7: memref<1x128xf32, #tpu.memory_space<vmem>>, %arg8: memref<8x128xf32, #tpu.memory_space<vmem>>, %arg9: memref<8x128xf32, #tpu.memory_space<vmem>>) attributes {dimension_semantics = [#tpu.dimension_semantics<parallel>], iteration_bounds = array<i64: 1>, scalar_prefetch = 0 : i64, scratch_operands = 0 : i64, tpu.core_type = #tpu.core_type<tc>, window_params = [{transform_indices = @transform_0, window_bounds = array<i64: 8, 256>}, {pipeline_mode = #tpu.pipeline_mode<synchronous>, transform_indices = @transform_1, window_bounds = array<i64: 256, 128>}, {pipeline_mode = #tpu.pipeline_mode<synchronous>, transform_indices = @transform_2, window_bounds = array<i64: 1, 128>}, {pipeline_mode = #tpu.pipeline_mode<synchronous>, transform_indices = @transform_3, window_bounds = array<i64: 128, 256>}, {pipeline_mode = #tpu.pipeline_mode<synchronous>, transform_indices = @transform_4, window_bounds = array<i64: 1, 256>}, {pipeline_mode = #tpu.pipeline_mode<synchronous>, transform_indices = @transform_5, window_bounds = array<i64: 256, 128>}, {pipeline_mode = #tpu.pipeline_mode<synchronous>, transform_indices = @transform_6, window_bounds = array<i64: 1, 128>}, {transform_indices = @transform_7, window_bounds = array<i64: 8, 128>}, {transform_indices = @transform_8, window_bounds = array<i64: 8, 128>}]} {
    %c0 = arith.constant 0 : index
    %c0_0 = arith.constant 0 : index
    %0 = vector.load %arg1[%c0, %c0_0] : memref<8x256xbf16, #tpu.memory_space<vmem>>, vector<8x256xbf16>
    %c0_1 = arith.constant 0 : index
    %c0_2 = arith.constant 0 : index
    %1 = vector.load %arg2[%c0_1, %c0_2] : memref<256x128xbf16, #tpu.memory_space<vmem>>, vector<256x128xbf16>
    %cst = arith.constant dense<0.000000e+00> : vector<8x128xf32>
    %2 = tpu.matmul %0, %1, %cst {dimension_numbers = #tpu.dot_dimension_numbers<[1], [0], [0], [1], [0, 0, 1, 1], [], []>} : vector<8x256xbf16>, vector<256x128xbf16>, vector<8x128xf32> -> vector<8x128xf32>
    %c0_3 = arith.constant 0 : index
    %c0_4 = arith.constant 0 : index
    %3 = vector.load %arg3[%c0_3, %c0_4] : memref<1x128xf32, #tpu.memory_space<vmem>>, vector<1x128xf32>
    %4 = vector.broadcast %3 : vector<1x128xf32> to vector<8x128xf32>
    %5 = arith.addf %2, %4 : vector<8x128xf32>
    %c0_5 = arith.constant 0 : index
    %c0_6 = arith.constant 0 : index
    %6 = vector.load %arg8[%c0_5, %c0_6] : memref<8x128xf32, #tpu.memory_space<vmem>>, vector<8x128xf32>
    tpu.vector_store %arg8[%c0_5, %c0_6], %5 {strides = array<i32>} : memref<8x128xf32, #tpu.memory_space<vmem>>, vector<8x128xf32>,
    %7 = arith.truncf %5 : vector<8x128xf32> to vector<8x128xbf16>
    %c0_7 = arith.constant 0 : index
    %c0_8 = arith.constant 0 : index
    %8 = vector.load %arg4[%c0_7, %c0_8] : memref<128x256xbf16, #tpu.memory_space<vmem>>, vector<128x256xbf16>
    %cst_9 = arith.constant dense<0.000000e+00> : vector<8x256xf32>
    %9 = tpu.matmul %7, %8, %cst_9 {dimension_numbers = #tpu.dot_dimension_numbers<[1], [0], [0], [1], [0, 0, 1, 1], [], []>} : vector<8x128xbf16>, vector<128x256xbf16>, vector<8x256xf32> -> vector<8x256xf32>
    %c0_10 = arith.constant 0 : index
    %c0_11 = arith.constant 0 : index
    %10 = vector.load %arg5[%c0_10, %c0_11] : memref<1x256xf32, #tpu.memory_space<vmem>>, vector<1x256xf32>
    %11 = vector.broadcast %10 : vector<1x256xf32> to vector<8x256xf32>
    %12 = arith.addf %9, %11 : vector<8x256xf32>
    %13 = arith.mulf %12, %12 : vector<8x256xf32>
    %14 = arith.mulf %12, %13 : vector<8x256xf32>
    %cst_12 = arith.constant 4.471500e-02 : f32
    %15 = vector.broadcast %cst_12 : f32 to vector<8x256xf32>
    %16 = arith.mulf %15, %14 : vector<8x256xf32>
    %17 = arith.addf %12, %16 : vector<8x256xf32>
    %cst_13 = arith.constant 0.797884583 : f32
    %18 = vector.broadcast %cst_13 : f32 to vector<8x256xf32>
    %19 = arith.mulf %18, %17 : vector<8x256xf32>
    %20 = math.tanh %19 : vector<8x256xf32>
    %cst_14 = arith.constant 1.000000e+00 : f32
    %21 = vector.broadcast %cst_14 : f32 to vector<8x256xf32>
    %22 = arith.addf %21, %20 : vector<8x256xf32>
    %cst_15 = arith.constant 5.000000e-01 : f32
    %23 = vector.broadcast %cst_15 : f32 to vector<8x256xf32>
    %24 = arith.mulf %23, %22 : vector<8x256xf32>
    %25 = arith.mulf %12, %24 : vector<8x256xf32>
    %26 = arith.truncf %25 : vector<8x256xf32> to vector<8x256xbf16>
    %c0_16 = arith.constant 0 : index
    %c0_17 = arith.constant 0 : index
    %27 = vector.load %arg6[%c0_16, %c0_17] : memref<256x128xbf16, #tpu.memory_space<vmem>>, vector<256x128xbf16>
    %cst_18 = arith.constant dense<0.000000e+00> : vector<8x128xf32>
    %28 = tpu.matmul %26, %27, %cst_18 {dimension_numbers = #tpu.dot_dimension_numbers<[1], [0], [0], [1], [0, 0, 1, 1], [], []>} : vector<8x256xbf16>, vector<256x128xbf16>, vector<8x128xf32> -> vector<8x128xf32>
    %c0_19 = arith.constant 0 : index
    %c0_20 = arith.constant 0 : index
    %29 = vector.load %arg7[%c0_19, %c0_20] : memref<1x128xf32, #tpu.memory_space<vmem>>, vector<1x128xf32>
    %30 = vector.broadcast %29 : vector<1x128xf32> to vector<8x128xf32>
    %31 = arith.addf %28, %30 : vector<8x128xf32>
    %c0_21 = arith.constant 0 : index
    %c0_22 = arith.constant 0 : index
    %32 = vector.load %arg9[%c0_21, %c0_22] : memref<8x128xf32, #tpu.memory_space<vmem>>, vector<8x128xf32>
    tpu.vector_store %arg9[%c0_21, %c0_22], %31 {strides = array<i32>} : memref<8x128xf32, #tpu.memory_space<vmem>>, vector<8x128xf32>,
    return
  }
  func.func @transform_0(%arg0: i32) -> (i32, i32) {
    %c0_i32 = arith.constant 0 : i32
    %c0_i32_0 = arith.constant 0 : i32
    return %arg0, %c0_i32 : i32, i32
  }
  func.func @transform_1(%arg0: i32) -> (i32, i32) {
    %c0_i32 = arith.constant 0 : i32
    %c0_i32_0 = arith.constant 0 : i32
    %c0_i32_1 = arith.constant 0 : i32
    return %c0_i32, %c0_i32_0 : i32, i32
  }
  func.func @transform_2(%arg0: i32) -> (i32, i32) {
    %c0_i32 = arith.constant 0 : i32
    %c0_i32_0 = arith.constant 0 : i32
    %c0_i32_1 = arith.constant 0 : i32
    return %c0_i32, %c0_i32_0 : i32, i32
  }
  func.func @transform_3(%arg0: i32) -> (i32, i32) {
    %c0_i32 = arith.constant 0 : i32
    %c0_i32_0 = arith.constant 0 : i32
    %c0_i32_1 = arith.constant 0 : i32
    return %c0_i32, %c0_i32_0 : i32, i32
  }
  func.func @transform_4(%arg0: i32) -> (i32, i32) {
    %c0_i32 = arith.constant 0 : i32
    %c0_i32_0 = arith.constant 0 : i32
    %c0_i32_1 = arith.constant 0 : i32
    return %c0_i32, %c0_i32_0 : i32, i32
  }
  func.func @transform_5(%arg0: i32) -> (i32, i32) {
    %c0_i32 = arith.constant 0 : i32
    %c0_i32_0 = arith.constant 0 : i32
    %c0_i32_1 = arith.constant 0 : i32
    return %c0_i32, %c0_i32_0 : i32, i32
  }
  func.func @transform_6(%arg0: i32) -> (i32, i32) {
    %c0_i32 = arith.constant 0 : i32
    %c0_i32_0 = arith.constant 0 : i32
    %c0_i32_1 = arith.constant 0 : i32
    return %c0_i32, %c0_i32_0 : i32, i32
  }
  func.func @transform_7(%arg0: i32) -> (i32, i32) {
    %c0_i32 = arith.constant 0 : i32
    %c0_i32_0 = arith.constant 0 : i32
    return %arg0, %c0_i32 : i32, i32
  }
  func.func @transform_8(%arg0: i32) -> (i32, i32) {
    %c0_i32 = arith.constant 0 : i32
    %c0_i32_0 = arith.constant 0 : i32
    return %arg0, %c0_i32 : i32, i32
  }
}

</mosaic_0001>

<bundles_post_ra>
// kernel: dino_classifier_forward.1
= control target key start
LH: loop header
LB: loop body
LE: loop exit
PB: predicated region body
PF: predicated region fallthrough
CT: control target
= control target key end

     0   :  { %v726_v35 = vmov 0   ;;  %v232_v60 = vlaneseq  ;;  %s934_s1 = inlined_call_operand.vmem [shape: bf16[256,128], index: 1, kind: input, shape index: {}]   ;;  %s935_s0 = inlined_call_operand.vmem [shape: bf16[8,256], index: 0, kind: input, shape index: {}]   ;;  %s936_s3 = inlined_call_operand.vmem [shape: bf16[128,256], index: 3, kind: input, shape index: {}]   ;;  %s937_s2 = inlined_call_operand.vmem [shape: f32[1,128], index: 2, kind: input, shape index: {}]   ;;  %s938_s7 = inlined_call_operand.vmem [shape: f32[8,128], index: 7, kind: output, shape index: {0}]   ;;  %s939_s5 = inlined_call_operand.vmem [shape: bf16[256,128], index: 5, kind: input, shape index: {}]   ;;  %s940_s4 = inlined_call_operand.vmem [shape: f32[1,256], index: 4, kind: input, shape index: {}]   ;;  %s941_s6 = inlined_call_operand.vmem [shape: f32[1,128], index: 6, kind: input, shape index: {}]   ;;  %s942_s8 = inlined_call_operand.vmem [shape: f32[8,128], index: 8, kind: output, shape index: {1}]  }
   0x1   :  { %v664_v0 = vld [vmem:[%s934_s1 + $0x40] sm:$0xff]   ;;  %v666_v2 = vld [vmem:[%s934_s1 + $0x48] sm:$0xff]   ;;  %v668_v4 = vld [vmem:[%s934_s1 + $0x50] sm:$0xff]   ;;  %354 = vmatprep.mubr.bf16.mxu1 %v726_v35 }
   0x2   :  { %v665_v1 = vld [vmem:[%s934_s1] sm:$0xff]   ;;  %619 = vmatprep.subr.bf16.mxu0 %v664_v0  ;;  %v667_v3 = vld [vmem:[%s934_s1 + $0x8] sm:$0xff]   ;;  %v669_v5 = vld [vmem:[%s934_s1 + $0x10] sm:$0xff]   ;;  %v233_v61 = vshrl.u32 %v232_v60, 7 }
   0x3   :  { %620 = vmatpush3.bf16.msra.mxu0 %v665_v1  ;;  %v670_v6 = vld [vmem:[%s934_s1 + $0x58] sm:$0xff]   ;;  %v672_v8 = vld [vmem:[%s934_s1 + $0x60] sm:$0xff]   ;;  %v674_v10 = vld [vmem:[%s934_s1 + $0x68] sm:$0xff]  }
   0x4   :  { %621 = vmatprep.subr.bf16.mxu0 %v666_v2  ;;  %v671_v7 = vld [vmem:[%s934_s1 + $0x18] sm:$0xff]   ;;  %v673_v9 = vld [vmem:[%s934_s1 + $0x20] sm:$0xff]   ;;  %v675_v16 = vld [vmem:[%s934_s1 + $0x28] sm:$0xff]   ;;  %v234_v62 = vsub.s32 0, %v233_v61  ;;  %v238_v0 = vsub.s32 1, %v233_v61 }
   0x5   :  { %v29_v11 = vld [vmem:[%s935_s0] sm:$0xff]  ;;  %v685_v15 = vld [vmem:[%s936_s3 + $0x14] ss:$8 sps:$4 sm:$0xff]   ;;  %v687_v18 = vld [vmem:[%s936_s3 + $0x10] ss:$8 sps:$4 sm:$0xff]  }
   0x6   :  { %v569_v12 = vcombine.high %v29_v11, %v29_v11  ;;  %v682_v13 = vld [vmem:[%s936_s3 + $0x4] ss:$8 sps:$4 sm:$0xff]   ;;  %v684_v14 = vld [vmem:[%s936_s3] ss:$8 sps:$4 sm:$0xff]   ;;  %v676_v17 = vld [vmem:[%s934_s1 + $0x70] sm:$0xff]   ;;  %v568_v26 = vcombine.low %v29_v11, %v29_v11 }
   0x7   :  { %622 = vmatpush3.bf16.msra.mxu0 %v667_v3  ;;  %322 = vmatprep.subr.bf16.mxu1 %v682_v13  ;;  %v688_v19 = vld [vmem:[%s936_s3 + $0x24] ss:$8 sps:$4 sm:$0xff]   ;;  %v677_v20 = vld [vmem:[%s934_s1 + $0x30] sm:$0xff]   ;;  %v678_v21 = vld [vmem:[%s934_s1 + $0x78] sm:$0xff]  }
   0x8   :  { %623 = vmatprep.subr.bf16.mxu0 %v668_v4  ;;  %204 = vmatprep.mubr.bf16.mxu0 %v569_v12  ;;  %v690_v22 = vld [vmem:[%s936_s3 + $0x20] ss:$8 sps:$4 sm:$0xff]   ;;  %v691_v23 = vld [vmem:[%s936_s3 + $0x34] ss:$8 sps:$4 sm:$0xff]   ;;  %v693_v25 = vld [vmem:[%s936_s3 + $0x30] ss:$8 sps:$4 sm:$0xff]  }
   0x9   :  { %323 = vmatpush1.bf16.msra.mxu1 %v684_v14  ;;  %v679_v24 = vld [vmem:[%s934_s1 + $0x38] sm:$0xff]   ;;  %v694_v27 = vld [vmem:[%s936_s3 + $0x44] ss:$8 sps:$4 sm:$0xff]   ;;  %v696_v28 = vld [vmem:[%s936_s3 + $0x40] ss:$8 sps:$4 sm:$0xff]  }
   0xa   :  { %324 = vmatprep.subr.bf16.mxu1 %v685_v15  ;;  %v697_v29 = vld [vmem:[%s936_s3 + $0x54] ss:$8 sps:$4 sm:$0xff]   ;;  %v699_v30 = vld [vmem:[%s936_s3 + $0x50] ss:$8 sps:$4 sm:$0xff]   ;;  %v700_v31 = vld [vmem:[%s936_s3 + $0x64] ss:$8 sps:$4 sm:$0xff]  }
   0xb   :  { %624 = vmatpush3.bf16.msra.mxu0 %v669_v5  ;;  %v702_v32 = vld [vmem:[%s936_s3 + $0x60] ss:$8 sps:$4 sm:$0xff]   ;;  %v703_v33 = vld [vmem:[%s936_s3 + $0x74] ss:$8 sps:$4 sm:$0xff]   ;;  %v705_v34 = vld [vmem:[%s936_s3 + $0x70] ss:$8 sps:$4 sm:$0xff]  }
   0xc   :  { %625 = vmatprep.subr.bf16.mxu0 %v670_v6  ;;  %v567_v37 = vld [vmem:[%s937_s2] ss:$0 sm:$0xff]  ;;  %v708_v46 = vld [vmem:[%s939_s5 + $0x48] sm:$0xff]   ;;  %v710_v48 = vld [vmem:[%s939_s5 + $0x50] sm:$0xff]  }
   0xd   :  { %325 = vmatpush1.bf16.msra.mxu1 %v687_v18  ;;  %v706_v44 = vld [vmem:[%s939_s5 + $0x40] sm:$0xff]   ;;  %v709_v47 = vld [vmem:[%s939_s5 + $0x8] sm:$0xff]   ;;  %v711_v49 = vld [vmem:[%s939_s5 + $0x10] sm:$0xff]  }
   0xe   :  { %326 = vmatprep.subr.bf16.mxu1 %v688_v19  ;;  %v707_v45 = vld [vmem:[%s939_s5] sm:$0xff]   ;;  %v712_v50 = vld [vmem:[%s939_s5 + $0x58] sm:$0xff]   ;;  %v716_v54 = vld [vmem:[%s939_s5 + $0x68] sm:$0xff]  }
   0xf   :  { %626 = vmatpush3.bf16.msra.mxu0 %v671_v7  ;;  %v713_v51 = vld [vmem:[%s939_s5 + $0x18] sm:$0xff]   ;;  %v714_v52 = vld [vmem:[%s939_s5 + $0x60] sm:$0xff]   ;;  %v717_v55 = vld [vmem:[%s939_s5 + $0x28] sm:$0xff]  }
  0x10   :  { %627 = vmatprep.subr.bf16.mxu0 %v672_v8  ;;  %v715_v53 = vld [vmem:[%s939_s5 + $0x20] sm:$0xff]   ;;  %v718_v56 = vld [vmem:[%s939_s5 + $0x70] sm:$0xff]   ;;  %v720_v58 = vld [vmem:[%s939_s5 + $0x78] sm:$0xff]  }
  0x11   :  { %327 = vmatpush1.bf16.msra.mxu1 %v690_v22  ;;  %v719_v57 = vld [vmem:[%s939_s5 + $0x30] sm:$0xff]   ;;  %v721_v59 = vld [vmem:[%s939_s5 + $0x38] sm:$0xff]   ;;  %v230_v63 = vld [vmem:[%s940_s4] sm:$0x3] }
  0x12   :  { %328 = vmatprep.subr.bf16.mxu1 %v691_v23  ;;  %v235_v1 = vrot.slane %v230_v63, %v234_v62  ;;  %v239_v2 = vrot.slane %v230_v63, %v238_v0 }
  0x13   :  { %628 = vmatpush3.bf16.msra.mxu0 %v673_v9 }
  0x14   :  { %629 = vmatprep.subr.bf16.mxu0 %v674_v10 }
  0x15   :  { %329 = vmatpush1.bf16.msra.mxu1 %v693_v25 }
  0x16   :  { %330 = vmatprep.subr.bf16.mxu1 %v694_v27 }
  0x17   :  { %630 = vmatpush3.bf16.msra.mxu0 %v675_v16 }
  0x18   :  { %631 = vmatprep.subr.bf16.mxu0 %v676_v17 }
  0x19   :  { %331 = vmatpush1.bf16.msra.mxu1 %v696_v28 }
  0x1a   :  { %332 = vmatprep.subr.bf16.mxu1 %v697_v29 }
  0x1b   :  { %632 = vmatpush3.bf16.msra.mxu0 %v677_v20 }
  0x1c   :  { %633 = vmatprep.subr.bf16.mxu0 %v678_v21 }
  0x1d   :  { %333 = vmatpush1.bf16.msra.mxu1 %v699_v30  ;;  %v602_v30 = vld [vmem:[%s941_s6] ss:$0 sm:$0xff] }
  0x1e   :  { %334 = vmatprep.subr.bf16.mxu1 %v700_v31 }
  0x1f   :  { %634 = vmatpush3.bf16.msra.mxu0 %v679_v24 }
  0x20   :  { %641 = vmatprep.subr.bf16.mxu0 %v706_v44 }
  0x21   :  { %335 = vmatpush1.bf16.msra.mxu1 %v702_v32 }
  0x22   :  { %205 = vmatmul.mubr.bf16.vlgmr.msra.gmra.mrb[0].mxu0 %v568_v26  ;;  %336 = vmatprep.subr.bf16.mxu1 %v703_v33 }
  0x23   :  { %642 = vmatpush3.bf16.msra.mxu0 %v707_v45 }
  0x24   :  { %643 = vmatprep.subr.bf16.mxu0 %v708_v46 }
  0x25   :  { %337 = vmatpush1.bf16.msra.mxu1 %v705_v34 }
  0x27   :  { %644 = vmatpush3.bf16.msra.mxu0 %v709_v47 }
  0x28   :  { %645 = vmatprep.subr.bf16.mxu0 %v710_v48 }
  0x2b   :  { %646 = vmatpush3.bf16.msra.mxu0 %v711_v49 }
  0x2c   :  { %647 = vmatprep.subr.bf16.mxu0 %v712_v50 }
  0x2f   :  { %648 = vmatpush3.bf16.msra.mxu0 %v713_v51 }
  0x30   :  { %649 = vmatprep.subr.bf16.mxu0 %v714_v52 }
  0x33   :  { %650 = vmatpush3.bf16.msra.mxu0 %v715_v53 }
  0x34   :  { %651 = vmatprep.subr.bf16.mxu0 %v716_v54 }
  0x37   :  { %652 = vmatpush3.bf16.msra.mxu0 %v717_v55 }
  0x38   :  { %653 = vmatprep.subr.bf16.mxu0 %v718_v56 }
  0x3b   :  { %654 = vmatpush3.bf16.msra.mxu0 %v719_v57 }
  0x3c   :  { %655 = vmatprep.subr.bf16.mxu0 %v720_v58 }
  0x3f   :  { %656 = vmatpush3.bf16.msra.mxu0 %v721_v59 }
  0xf5   :  { %v635_v36 = vpop.f32.mrb[0].mxu0 }
  0xf6   :  { %v636_v38 = vpop.f32.mrb[1].mxu0 }
  0xf7   :  { %v637_v39 = vadd.f32 %v636_v38, %v635_v36  ;;  %v638_v40 = vpop.f32.mrb[2].mxu0 }
  0xf8   :  { %v639_v41 = vpop.f32.mrb[3].mxu0 }
  0xf9   :  { %v207_v42 = vadd.f32 %v637_v39, %v567_v37 }
  0xfb   :  { %212 = vst [vmem:[%s938_s7] sm:$0xff] %v207_v42  ;;  %v213_v43 = vpack.c.bf16 %v207_v42, %v207_v42 }
  0xfd   :  { %355 = vmatmul.mubr.bf16.vlgmr.msra.gmra.mrb[0].mxu1 %v213_v43 }
 0x1d0   :  { %v356_v3 = vpop.f32.mrb[0].mxu1 }
 0x1d1   :  { %v357_v4 = vadd.f32 %v356_v3, %v235_v1  ;;  %v358_v5 = vpop.f32.mrb[1].mxu1 }
 0x1d2   :  { %v359_v6 = vadd.f32 %v358_v5, %v239_v2  ;;  %v360_v7 = vpop.f32.mrb[2].mxu1 }
 0x1d3   :  { %v363_v8 = vmul.f32 %v357_v4, %v357_v4  ;;  %v361_v9 = vpop.f32.mrb[3].mxu1 }
 0x1d4   :  { %v364_v10 = vmul.f32 %v359_v6, %v359_v6 }
 0x1d5   :  { %v365_v11 = vmul.f32 %v363_v8, %v357_v4 }
 0x1d6   :  { %v366_v12 = vmul.f32 %v364_v10, %v359_v6 }
 0x1d7   :  { %v367_v13 = vmul.f32 0.044715, %v365_v11 }
 0x1d8   :  { %v368_v14 = vmul.f32 0.044715, %v366_v12 }
 0x1d9   :  { %v369_v15 = vadd.f32 %v367_v13, %v357_v4 }
 0x1da   :  { %v370_v16 = vadd.f32 %v368_v14, %v359_v6 }
 0x1db   :  { %v371_v17 = vmul.f32 0.7978846, %v369_v15 }
 0x1dc   :  { %v372_v18 = vmul.f32 0.7978846, %v370_v16 }
 0x1dd   :  { %722 = vtanh.f32 %v371_v17 }
 0x1de   :  { %724 = vtanh.f32 %v372_v18 }
 0x1e7   :  { %v723_v19 = vpop.eup %722 }
 0x1e8   :  { %v725_v20 = vpop.eup %724  ;;  %v375_v21 = vadd.f32 1.0, %v723_v19 }
 0x1e9   :  { %v376_v22 = vadd.f32 1.0, %v725_v20 }
 0x1ea   :  { %v377_v23 = vmul.f32 0.5, %v375_v21 }
 0x1eb   :  { %v378_v24 = vmul.f32 0.5, %v376_v22 }
 0x1ec   :  { %v379_v25 = vmul.f32 %v377_v23, %v357_v4 }
 0x1ed   :  { %v380_v26 = vmul.f32 %v378_v24, %v359_v6 }
 0x1ee   :  { %v381_v28 = vpack.c.bf16 %v379_v25, %v379_v25 }
 0x1ef   :  { %v382_v27 = vpack.c.bf16 %v380_v26, %v380_v26 }
 0x1f1   :  { %550 = vmatprep.mubr.bf16.mxu0 %v382_v27 }
 0x1f2   :  { %551 = vmatmul.mubr.bf16.vlgmr.msra.gmra.mrb[4].mxu0 %v381_v28 }
 0x2c5   :  { %v657_v29 = vpop.f32.mrb[4].mxu0 }
 0x2c6   :  { %v658_v31 = vpop.f32.mrb[5].mxu0 }
 0x2c7   :  { %v659_v32 = vadd.f32 %v658_v31, %v657_v29  ;;  %v660_v33 = vpop.f32.mrb[6].mxu0 }
 0x2c8   :  { %v661_v34 = vpop.f32.mrb[7].mxu0 }
 0x2c9   :  { %v553_v35 = vadd.f32 %v659_v32, %v602_v30 }
 0x2cb   :  { %558 = vst [vmem:[%s942_s8] sm:$0xff] %v553_v35 }

</bundles_post_ra>
